<compile_context>
chip_gen: v5e
topology: v5e:2x2
jax: 0.10.0
libtpu: 0.0.40
codegen_flags: <defaults>
</compile_context>

<pallas_src>
import functools

import numpy as np
import jax
import jax.numpy as jnp
from jax.experimental import pallas as pl
from jax.experimental.pallas import tpu as pltpu


def _round_up(x, m):
    return (x + m - 1) // m * m


def _default_n_split():
    """2 only on dual-TensorCore chips (v7x); the split is wasted on v5e/v6e."""
    try:
        d = jax.devices()[0]
        if getattr(d, "num_cores", 1) >= 2:
            return 2
        if "v7" in str(getattr(d, "device_kind", "")).lower():
            return 2
    except Exception:
        pass
    return 1


def _lcc_kernel(i_ref, j_ref, band_ref, out_ref, acc_ref, *,
                win, eps, tiles_per_split, packed_rows, need_mask):
    """One row-tile of the local cross-correlation loss.

    i_ref, j_ref : (B, Wp) input tiles (any float dtype; upcast here)
    band_ref     : (Wp, Wp) f32 block-diagonal banded 0/1 matrix (constant input)
    out_ref      : (8, 128) per-split partial-sum block (written in epilogue)
    acc_ref      : (B, Wp) f32 scratch, running sum of cc over this split's tiles
    """
    s = pl.program_id(0)
    t = pl.program_id(1)
    inv_win = 1.0 / float(win)

    @pl.when(t == 0)
    def _init():
        acc_ref[...] = jnp.zeros_like(acc_ref)

    I = i_ref[...].astype(jnp.float32)
    J = j_ref[...].astype(jnp.float32)
    band = band_ref[...]

    # Windowed sums along W as banded matmuls (elementwise products feed the MXU
    # directly -- no explicit staging scratch).
    I_sum = jnp.dot(I, band, preferred_element_type=jnp.float32)
    J_sum = jnp.dot(J, band, preferred_element_type=jnp.float32)
    I2_sum = jnp.dot(I * I, band, preferred_element_type=jnp.float32)
    J2_sum = jnp.dot(J * J, band, preferred_element_type=jnp.float32)
    IJ_sum = jnp.dot(I * J, band, preferred_element_type=jnp.float32)

    # Algebraically simplified epilogue (identical to the torch formula).
    cross = IJ_sum - I_sum * J_sum * inv_win
    I_var = I2_sum - I_sum * I_sum * inv_win
    J_var = J2_sum - J_sum * J_sum * inv_win

    den = I_var * J_var + eps
    r = pl.reciprocal(den, approx=True)
    r = r * (2.0 - den * r)               # one Newton step -> ~f32 accuracy, stays on EUP/VPU
    cc = cross * cross * r

    if need_mask:
        # Zero contributions from grid-tail rows (rows beyond the real data).
        br = i_ref.shape[0]
        row0 = (s * tiles_per_split + t) * br
        rid = row0 + jax.lax.broadcasted_iota(jnp.int32, cc.shape, 0)
        cc = jnp.where(rid < packed_rows, cc, 0.0)

    # Wide VPU accumulation; scalarization deferred to the epilogue.
    acc_ref[...] += cc

    @pl.when(t == pl.num_programs(1) - 1)
    def _fin():
        out_ref[...] = jnp.zeros_like(out_ref) + jnp.sum(acc_ref[...])


def local_cross_correlation(I, J, win=9, eps=1e-5, block_rows=None, n_split=None,
                            max_pack=None):
    """lcc = -mean(cc) + 1, matching the PyTorch module semantics."""
    N, C, H, W = I.shape
    assert C == 1, "module expects single-channel input"
    assert win % 2 == 1, "win must be odd to match the conv2d padding semantics"

    rows = N * H
    total = float(N * C * H * W)
    pad = win // 2

    # ---- lane packing: fold `pack` image rows into the lane dim when W is narrow
    LANE_TARGET = 256
    p_cap = max(1, LANE_TARGET // W) if W < LANE_TARGET else 1
    if max_pack is not None:
        p_cap = min(p_cap, max(1, int(max_pack)))
    p_cap = min(p_cap, rows)
    pack = 1
    for cand in range(p_cap, 0, -1):
        if rows % cand == 0:          # pack must divide rows -> free reshape, no pad copy
            pack = cand
            break
    W_p = pack * W
    packed_rows = rows // pack

    Ir = I.reshape(packed_rows, W_p)   # free reshape, native dtype on the wire
    Jr = J.reshape(packed_rows, W_p)
    itemsize = jnp.dtype(Ir.dtype).itemsize

    # Block-diagonal band: within each of the `pack` W-wide lane blocks,
    # band[a, b] = 1 iff |a - b| <= win // 2  (== conv2d(ones(1,1,1,win), pad=(0, win//2))).
    idx = np.arange(W_p)
    band_np = ((np.abs(idx[:, None] - idx[None, :]) <= pad) &
               ((idx[:, None] // W) == (idx[None, :] // W))).astype(np.float32)
    band = jnp.asarray(band_np)
    # TODO(synk): large-W path (K-tiled banded matmul or pltpu.roll shift-and-add,
    # optionally bf16 band/LHS once MXU-bound) not implemented; guarded below.

    # ---- row-tile sizing with explicit VMEM accounting --------------------------
    if packed_rows <= 8:
        br = packed_rows                                     # block equals full dim
    else:
        if block_rows is None:
            target_elems = 512 * 1024                        # per operand per tile
            br = (target_elems // max(W_p, 1)) // 8 * 8
            br = max(8, min(br, 2048))
        else:
            br = _round_up(max(8, int(block_rows)), 8)
        br = min(br, _round_up(packed_rows, 8))

    def vmem_estimate(b):
        tile = b * W_p
        return (2 * 2 * tile * itemsize      # double-buffered I and J input blocks
                + 2 * W_p * W_p * 4          # band block (+ spare buffer)
                + tile * 4                   # cc accumulator scratch
                + 10 * tile * 4              # compiler temps: upcasts, products, 5 dot results
                + 2 * 8 * 128 * 4)

    VMEM_BUDGET = 40 * 1024 * 1024           # leaves headroom under v7x's 64 MiB physical
    while br > 8 and vmem_estimate(br) > VMEM_BUDGET:
        br = max(8, (br // 2) // 8 * 8)
    if vmem_estimate(br) > VMEM_BUDGET:
        raise NotImplementedError(
            "local_cross_correlation: W too large for the dense-band path "
            "(VMEM budget exceeded); banded/roll windowed-sum path not implemented yet.")

    n_tiles = -(-packed_rows // br)
    if n_split is None:
        n_split = _default_n_split()
    n_split = max(1, min(int(n_split), n_tiles))
    tiles_per_split = -(-n_tiles // n_split)
    need_mask = (n_split * tiles_per_split * br) != packed_rows

    if n_split * tiles_per_split > n_tiles:
        # Excess grid steps re-visit the last real tile (DMA skipped when the block
        # index is unchanged) and are zeroed by the in-kernel row mask.
        def in_map(s, t):
            return (jnp.minimum(s * tiles_per_split + t, n_tiles - 1), 0)
    else:
        def in_map(s, t):
            return (s * tiles_per_split + t, 0)

    kernel = functools.partial(
        _lcc_kernel, win=int(win), eps=float(eps),
        tiles_per_split=int(tiles_per_split), packed_rows=int(packed_rows),
        need_mask=bool(need_mask))

    covered_rows = n_split * tiles_per_split * br
    flops = 2 * 5 * covered_rows * W_p * W_p + 14 * covered_rows * W_p
    bytes_accessed = 2 * Ir.size * itemsize + band.size * 4 + n_split * 8 * 128 * 4

    out = pl.pallas_call(
        kernel,
        out_shape=jax.ShapeDtypeStruct((n_split * 8, 128), jnp.float32),
        grid_spec=pltpu.PrefetchScalarGridSpec(
            num_scalar_prefetch=0,
            grid=(n_split, tiles_per_split),
            in_specs=[
                pl.BlockSpec((br, W_p), in_map),
                pl.BlockSpec((br, W_p), in_map),
                pl.BlockSpec((W_p, W_p), lambda s, t: (0, 0)),   # constant -> fetched once
            ],
            out_specs=pl.BlockSpec((8, 128), lambda s, t: (s, 0)),
            scratch_shapes=[
                pltpu.VMEM((br, W_p), jnp.float32),              # cc accumulator
            ],
        ),
        compiler_params=pltpu.CompilerParams(
            dimension_semantics=("parallel", "arbitrary"),
            vmem_limit_bytes=48 * 1024 * 1024,
        ),
        cost_estimate=pl.CostEstimate(
            flops=int(flops), transcendentals=int(covered_rows * W_p),
            bytes_accessed=int(bytes_accessed)),
    )(Ir, Jr, band)

    partials = out.reshape(n_split, 8, 128)[:, 0, 0]
    return -jnp.sum(partials) / total + 1.0


def _reference_lcc(I, J, win=9, eps=1e-5):
    """Pure-JAX reference mirroring the PyTorch forward."""
    pad = win // 2
    W = I.shape[-1]

    def wsum(x):
        xp = jnp.pad(x, ((0, 0), (0, 0), (0, 0), (pad, pad)))
        return sum(xp[..., k:k + W] for k in range(win))

    I_sum = wsum(I)
    J_sum = wsum(J)
    I2_sum = wsum(I * I)
    J2_sum = wsum(J * J)
    IJ_sum = wsum(I * J)
    u_I = I_sum / win
    u_J = J_sum / win
    cross = IJ_sum - u_J * I_sum - u_I * J_sum + u_I * u_J * win
    I_var = I2_sum - 2 * u_I * I_sum + u_I * u_I * win
    J_var = J2_sum - 2 * u_J * J_sum + u_J * u_J * win
    cc = cross * cross / (I_var * J_var + eps)
    return -1.0 * jnp.mean(cc) + 1.0


if __name__ == "__main__":
    key = jax.random.PRNGKey(0)
    k1, k2, k3, k4, k5, k6 = jax.random.split(key, 6)

    # Case 1: canonical small shape, default settings -> lane-packing (pack=16,
    # Wp=256), single tile, no masking.
    N, C, H, W = 2, 1, 16, 16
    I1 = jax.random.normal(k1, (N, C, H, W), dtype=jnp.float32)
    J1 = jax.random.normal(k2, (N, C, H, W), dtype=jnp.float32)
    got1 = local_cross_correlation(I1, J1, win=9, eps=1e-5)
    jax.block_until_ready(got1)
    ref1 = _reference_lcc(I1, J1, win=9, eps=1e-5)
    assert jnp.allclose(got1, ref1, atol=1e-4, rtol=1e-4), (got1, ref1)

    # Case 2: packing disabled, row count not a tile multiple, 2-way split ->
    # exercises clamped index map, in-kernel tail masking, multi-tile accumulation
    # and the per-split partial-sum outputs.
    N, C, H, W = 2, 1, 20, 16
    I2 = jax.random.normal(k3, (N, C, H, W), dtype=jnp.float32)
    J2 = jax.random.normal(k4, (N, C, H, W), dtype=jnp.float32)
    got2 = local_cross_correlation(I2, J2, win=9, eps=1e-5,
                                   block_rows=16, n_split=2, max_pack=1)
    jax.block_until_ready(got2)
    ref2 = _reference_lcc(I2, J2, win=9, eps=1e-5)
    assert jnp.allclose(got2, ref2, atol=1e-4, rtol=1e-4), (got2, ref2)

    # Case 3: wider image (W=128 -> pack=2, Wp=256), different window size.
    N, C, H, W = 2, 1, 64, 128
    I3 = jax.random.normal(k5, (N, C, H, W), dtype=jnp.float32)
    J3 = jax.random.normal(k6, (N, C, H, W), dtype=jnp.float32)
    got3 = local_cross_correlation(I3, J3, win=5, eps=1e-5)
    jax.block_until_ready(got3)
    ref3 = _reference_lcc(I3, J3, win=5, eps=1e-5)
    assert jnp.allclose(got3, ref3, atol=1e-4, rtol=1e-4), (got3, ref3)

    print("KERNEL_OK")
</pallas_src>

<mosaic_0001>
module attributes {stable_mosaic.version = 11 : i64} {
  func.func @_lcc_kernel(%arg0: i32, %arg1: i32, %arg2: memref<2x256xf32, #tpu.memory_space<vmem>>, %arg3: memref<2x256xf32, #tpu.memory_space<vmem>>, %arg4: memref<256x256xf32, #tpu.memory_space<vmem>>, %arg5: memref<8x128xf32, #tpu.memory_space<vmem>>, %arg6: memref<2x256xf32, #tpu.memory_space<vmem>>) attributes {dimension_semantics = [#tpu.dimension_semantics<parallel>, #tpu.dimension_semantics<arbitrary>], iteration_bounds = array<i64: 1, 1>, scalar_prefetch = 0 : i64, scratch_operands = 1 : i64, tpu.core_type = #tpu.core_type<tc>, window_params = [{transform_indices = @transform_0, window_bounds = array<i64: 2, 256>}, {transform_indices = @transform_1, window_bounds = array<i64: 2, 256>}, {pipeline_mode = #tpu.pipeline_mode<synchronous>, transform_indices = @transform_2, window_bounds = array<i64: 256, 256>}, {transform_indices = @transform_3, window_bounds = array<i64: 8, 128>}]} {
    %c0_i32 = arith.constant 0 : i32
    %0 = arith.cmpi eq, %arg1, %c0_i32 : i32
    %1 = arith.extui %0 : i1 to i32
    %c0_i32_0 = arith.constant 0 : i32
    %2 = arith.cmpi ne, %1, %c0_i32_0 : i32
    scf.if %2 {
      %cst_21 = arith.constant 0.000000e+00 : f32
      %42 = vector.broadcast %cst_21 : f32 to vector<2x256xf32>
      %c0_22 = arith.constant 0 : index
      %c0_23 = arith.constant 0 : index
      %43 = vector.load %arg6[%c0_22, %c0_23] : memref<2x256xf32, #tpu.memory_space<vmem>>, vector<2x256xf32>
      tpu.vector_store %arg6[%c0_22, %c0_23], %42 {strides = array<i32>} : memref<2x256xf32, #tpu.memory_space<vmem>>, vector<2x256xf32>,
    } else {
    }
    %c0 = arith.constant 0 : index
    %c0_1 = arith.constant 0 : index
    %3 = vector.load %arg2[%c0, %c0_1] : memref<2x256xf32, #tpu.memory_space<vmem>>, vector<2x256xf32>
    %c0_2 = arith.constant 0 : index
    %c0_3 = arith.constant 0 : index
    %4 = vector.load %arg3[%c0_2, %c0_3] : memref<2x256xf32, #tpu.memory_space<vmem>>, vector<2x256xf32>
    %c0_4 = arith.constant 0 : index
    %c0_5 = arith.constant 0 : index
    %5 = vector.load %arg4[%c0_4, %c0_5] : memref<256x256xf32, #tpu.memory_space<vmem>>, vector<256x256xf32>
    %cst = arith.constant dense<0.000000e+00> : vector<2x256xf32>
    %6 = tpu.matmul %3, %5, %cst {dimension_numbers = #tpu.dot_dimension_numbers<[1], [0], [0], [1], [0, 0, 1, 1], [], []>} : vector<2x256xf32>, vector<256x256xf32>, vector<2x256xf32> -> vector<2x256xf32>
    %cst_6 = arith.constant dense<0.000000e+00> : vector<2x256xf32>
    %7 = tpu.matmul %4, %5, %cst_6 {dimension_numbers = #tpu.dot_dimension_numbers<[1], [0], [0], [1], [0, 0, 1, 1], [], []>} : vector<2x256xf32>, vector<256x256xf32>, vector<2x256xf32> -> vector<2x256xf32>
    %8 = arith.mulf %3, %3 : vector<2x256xf32>
    %cst_7 = arith.constant dense<0.000000e+00> : vector<2x256xf32>
    %9 = tpu.matmul %8, %5, %cst_7 {dimension_numbers = #tpu.dot_dimension_numbers<[1], [0], [0], [1], [0, 0, 1, 1], [], []>} : vector<2x256xf32>, vector<256x256xf32>, vector<2x256xf32> -> vector<2x256xf32>
    %10 = arith.mulf %4, %4 : vector<2x256xf32>
    %cst_8 = arith.constant dense<0.000000e+00> : vector<2x256xf32>
    %11 = tpu.matmul %10, %5, %cst_8 {dimension_numbers = #tpu.dot_dimension_numbers<[1], [0], [0], [1], [0, 0, 1, 1], [], []>} : vector<2x256xf32>, vector<256x256xf32>, vector<2x256xf32> -> vector<2x256xf32>
    %12 = arith.mulf %3, %4 : vector<2x256xf32>
    %cst_9 = arith.constant dense<0.000000e+00> : vector<2x256xf32>
    %13 = tpu.matmul %12, %5, %cst_9 {dimension_numbers = #tpu.dot_dimension_numbers<[1], [0], [0], [1], [0, 0, 1, 1], [], []>} : vector<2x256xf32>, vector<256x256xf32>, vector<2x256xf32> -> vector<2x256xf32>
    %14 = arith.mulf %6, %7 : vector<2x256xf32>
    %cst_10 = arith.constant 0.111111112 : f32
    %15 = vector.broadcast %cst_10 : f32 to vector<2x256xf32>
    %16 = arith.mulf %14, %15 : vector<2x256xf32>
    %17 = arith.subf %13, %16 : vector<2x256xf32>
    %18 = arith.mulf %6, %6 : vector<2x256xf32>
    %cst_11 = arith.constant 0.111111112 : f32
    %19 = vector.broadcast %cst_11 : f32 to vector<2x256xf32>
    %20 = arith.mulf %18, %19 : vector<2x256xf32>
    %21 = arith.subf %9, %20 : vector<2x256xf32>
    %22 = arith.mulf %7, %7 : vector<2x256xf32>
    %cst_12 = arith.constant 0.111111112 : f32
    %23 = vector.broadcast %cst_12 : f32 to vector<2x256xf32>
    %24 = arith.mulf %22, %23 : vector<2x256xf32>
    %25 = arith.subf %11, %24 : vector<2x256xf32>
    %26 = arith.mulf %21, %25 : vector<2x256xf32>
    %cst_13 = arith.constant 9.99999974E-6 : f32
    %27 = vector.broadcast %cst_13 : f32 to vector<2x256xf32>
    %28 = arith.addf %26, %27 : vector<2x256xf32>
    %29 = tpu.reciprocal %28 {approx = true} : vector<2x256xf32> -> vector<2x256xf32>
    %30 = arith.mulf %28, %29 : vector<2x256xf32>
    %cst_14 = arith.constant 2.000000e+00 : f32
    %31 = vector.broadcast %cst_14 : f32 to vector<2x256xf32>
    %32 = arith.subf %31, %30 : vector<2x256xf32>
    %33 = arith.mulf %29, %32 : vector<2x256xf32>
    %34 = arith.mulf %17, %17 : vector<2x256xf32>
    %35 = arith.mulf %34, %33 : vector<2x256xf32>
    %c0_15 = arith.constant 0 : index
    %c0_16 = arith.constant 0 : index
    %36 = vector.load %arg6[%c0_15, %c0_16] : memref<2x256xf32, #tpu.memory_space<vmem>>, vector<2x256xf32>
    %37 = arith.addf %36, %35 : vector<2x256xf32>
    %c0_17 = arith.constant 0 : index
    %c0_18 = arith.constant 0 : index
    %38 = vector.load %arg6[%c0_17, %c0_18] : memref<2x256xf32, #tpu.memory_space<vmem>>, vector<2x256xf32>
    tpu.vector_store %arg6[%c0_17, %c0_18], %37 {strides = array<i32>} : memref<2x256xf32, #tpu.memory_space<vmem>>, vector<2x256xf32>,
    %c0_i32_19 = arith.constant 0 : i32
    %39 = arith.cmpi eq, %arg1, %c0_i32_19 : i32
    %40 = arith.extui %39 : i1 to i32
    %c0_i32_20 = arith.constant 0 : i32
    %41 = arith.cmpi ne, %40, %c0_i32_20 : i32
    scf.if %41 {
      %cst_21 = arith.constant 0.000000e+00 : f32
      %42 = vector.broadcast %cst_21 : f32 to vector<8x128xf32>
      %c0_22 = arith.constant 0 : index
      %c0_23 = arith.constant 0 : index
      %43 = vector.load %arg6[%c0_22, %c0_23] : memref<2x256xf32, #tpu.memory_space<vmem>>, vector<2x256xf32>
      %44 = vector.shape_cast %43 : vector<2x256xf32> to vector<1x2x256xf32>
      %cst_24 = arith.constant dense<0.000000e+00> : vector<1xf32>
      %45 = vector.multi_reduction <add>, %44, %cst_24 [1, 2] : vector<1x2x256xf32> to vector<1xf32>
      %46 = vector.shape_cast %45 : vector<1xf32> to vector<1x1x1xf32>
      %47 = vector.extract %46[0, 0, 0] : f32 from vector<1x1x1xf32>
      %48 = vector.broadcast %47 : f32 to vector<8x128xf32>
      %49 = arith.addf %42, %48 : vector<8x128xf32>
      %c0_25 = arith.constant 0 : index
      %c0_26 = arith.constant 0 : index
      %50 = vector.load %arg5[%c0_25, %c0_26] : memref<8x128xf32, #tpu.memory_space<vmem>>, vector<8x128xf32>
      tpu.vector_store %arg5[%c0_25, %c0_26], %49 {strides = array<i32>} : memref<8x128xf32, #tpu.memory_space<vmem>>, vector<8x128xf32>,
    } else {
    }
    return
  }
  func.func @transform_0(%arg0: i32, %arg1: i32) -> (i32, i32) {
    %c1_i32 = arith.constant 1 : i32
    %0 = arith.muli %arg0, %c1_i32 : i32
    %1 = arith.addi %0, %arg1 : i32
    %c0_i32 = arith.constant 0 : i32
    %c0_i32_0 = arith.constant 0 : i32
    return %1, %c0_i32 : i32, i32
  }
  func.func @transform_1(%arg0: i32, %arg1: i32) -> (i32, i32) {
    %c1_i32 = arith.constant 1 : i32
    %0 = arith.muli %arg0, %c1_i32 : i32
    %1 = arith.addi %0, %arg1 : i32
    %c0_i32 = arith.constant 0 : i32
    %c0_i32_0 = arith.constant 0 : i32
    return %1, %c0_i32 : i32, i32
  }
  func.func @transform_2(%arg0: i32, %arg1: i32) -> (i32, i32) {
    %c0_i32 = arith.constant 0 : i32
    %c0_i32_0 = arith.constant 0 : i32
    %c0_i32_1 = arith.constant 0 : i32
    return %c0_i32, %c0_i32_0 : i32, i32
  }
  func.func @transform_3(%arg0: i32, %arg1: i32) -> (i32, i32) {
    %c0_i32 = arith.constant 0 : i32
    %c0_i32_0 = arith.constant 0 : i32
    return %arg0, %c0_i32 : i32, i32
  }
}

</mosaic_0001>

<bundles_post_ra>
// kernel: tpu_custom_call.1
= control target key start
LH: loop header
LB: loop body
LE: loop exit
PB: predicated region body
PF: predicated region fallthrough
CT: control target
= control target key end

     0   :  { %8 = vsyncpa [#allocation4], 0  ;;  %s1301_s0 = inlined_call_operand.hbm [shape: f32[2,256], index: 0, kind: input, shape index: {}]   ;;  %s1302_s1 = inlined_call_operand.hbm [shape: f32[2,256], index: 1, kind: input, shape index: {}]   ;;  %s1303_s2 = inlined_call_operand.hbm [shape: f32[256,256], index: 2, kind: input, shape index: {}]   ;;  %s1304_s3 = inlined_call_operand.hbm [shape: f32[8,128], index: 3, kind: output, shape index: {}]  }
   0x1   :  { %9 = vsyncpa [#allocation7], 0  ;;  %s35_s14 = sshll.u32 %s1302_s1, 4  ;;  %s36_s14 = int_to_ptr.hbm [resolvable:$true] %s35_s14 }
   0x2   :  { %10 = vsyncpa [#allocation5], 0  ;;  %s773_s15 = smov [#allocation6]   ;;  %s20_s19 = sshll.u32 %s1301_s0, 4  ;;  %s21_s19 = int_to_ptr.hbm [resolvable:$true] %s20_s19 }
   0x3   :  { %s37_s16 = sshll.u32 %s773_s15, 4  ;;  %s774_s20 = smov [#allocation3]   ;;  %s38_s16 = int_to_ptr.vmem [resolvable:$true] %s37_s16 }
   0x4   :  { %40 = dma.hbm_to_vmem [thread:$0]  %s36_s14, 64, %s38_s16, [#allocation7]  }
   0x5   :  { %s22_s21 = sshll.u32 %s774_s20, 4  ;;  %s45_s24 = sshll.u32 %s1303_s2, 4  ;;  %s23_s21 = int_to_ptr.vmem [resolvable:$true] %s22_s21  ;;  %s46_s24 = int_to_ptr.hbm [resolvable:$true] %s45_s24 }
   0x6   :  { %25 = dma.hbm_to_vmem [thread:$0]  %s21_s19, 64, %s23_s21, [#allocation4]  }
   0x7   :  { %s775_s1 = smov [#allocation8]   ;;  %s776_s26 = smov 256  }
   0x8   :  { %s47_s25 = sshll.u32 %s775_s1, 4  ;;  %s777_s27 = smov 16   ;;  %s48_s25 = int_to_ptr.vmem [resolvable:$true] %s47_s25 }
   0x9   :  { %53 = dma.hbm_to_vmem [thread:$0]  %s46_s24, 8192, %s48_s25, [#allocation7], %s776_s26, %s776_s26, %s777_s27  }
   0xa   :  { %767 = dma.done.wait [#allocation4], 64  }
   0xb   :  { %768 = vsyncadd [#allocation4], 4294967232 }
   0xc   :  { %769 = dma.done.wait [#allocation7], 8256  }
   0xd   :  { %770 = vsyncadd [#allocation7], 4294959040  ;;  %v809_v0 = vld [vmem:[#allocation8 + $0xf0] sm:$0xff]  ;;  %v813_v2 = vld [vmem:[#allocation8 + $0xf8] sm:$0xff]  ;;  %vm610_vm0 = vcmask 1041408   ;;  %s779_s0 = smov [#allocation9]  }
   0xe   :  { %1336 = vst [vmem:[#allocation13_spill] sm:$0xff] %v809_v0  ;;  %v811_v1 = vld [vmem:[#allocation8 + $0x1f0] sm:$0xff]  ;;  %145 = vmatpush.msra.mxu0 %v809_v0  ;;  %v817_v3 = vld [vmem:[#allocation8 + $0x1f8] sm:$0xff]  ;;  %v819_v4 = vld [vmem:[#allocation8 + $0xe0] sm:$0xff]  ;;  %185 = vmatpush.msra.mxu2 %v813_v2  ;;  %s645_s2 = sshll.u32 %s779_s0, 4  ;;  %s647_s30 = sshll.u32 %s1304_s3, 4  ;;  %s646_s2 = int_to_ptr.vmem [resolvable:$true] %s645_s2  ;;  %s648_s30 = int_to_ptr.hbm [resolvable:$true] %s647_s30 }
   0xf   :  { %1337 = vst [vmem:[#allocation14_spill] sm:$0xff] %v811_v1  ;;  %165 = vmatpush.msra.mxu1 %v811_v1  ;;  %v821_v5 = vld [vmem:[#allocation8 + $0x1e0] sm:$0xff]  ;;  %205 = vmatpush.msra.mxu3 %v817_v3  ;;  %v825_v6 = vld [vmem:[#allocation8 + $0xe8] sm:$0xff]  ;;  %v829_v8 = vld [vmem:[#allocation8 + $0xd0] sm:$0xff] }
  0x10   :  { %v827_v7 = vld [vmem:[#allocation8 + $0x1e8] sm:$0xff]  ;;  %146 = vmatpush.msra.mxu0 %v819_v4  ;;  %v833_v9 = vld [vmem:[#allocation8 + $0x1d0] sm:$0xff]  ;;  %v835_v10 = vld [vmem:[#allocation8 + $0xd8] sm:$0xff]  ;;  %186 = vmatpush.msra.mxu2 %v825_v6 }
  0x11   :  { %166 = vmatpush.msra.mxu1 %v821_v5  ;;  %v837_v11 = vld [vmem:[#allocation8 + $0x1d8] sm:$0xff]  ;;  %206 = vmatpush.msra.mxu3 %v827_v7  ;;  %v841_v12 = vld [vmem:[#allocation8 + $0xc0] sm:$0xff]  ;;  %v847_v14 = vld [vmem:[#allocation8 + $0xc8] sm:$0xff] }
  0x12   :  { %v843_v13 = vld [vmem:[#allocation8 + $0x1c0] sm:$0xff]  ;;  %147 = vmatpush.msra.mxu0 %v829_v8  ;;  %v849_v15 = vld [vmem:[#allocation8 + $0x1c8] sm:$0xff]  ;;  %187 = vmatpush.msra.mxu2 %v835_v10  ;;  %v853_v16 = vld [vmem:[#allocation8 + $0xb0] sm:$0xff] }
  0x13   :  { %167 = vmatpush.msra.mxu1 %v833_v9  ;;  %207 = vmatpush.msra.mxu3 %v837_v11  ;;  %v855_v17 = vld [vmem:[#allocation8 + $0x1b0] sm:$0xff]  ;;  %v859_v18 = vld [vmem:[#allocation8 + $0xb8] sm:$0xff]  ;;  %v865_v20 = vld [vmem:[#allocation8 + $0xa0] sm:$0xff] }
  0x14   :  { %148 = vmatpush.msra.mxu0 %v841_v12  ;;  %v861_v19 = vld [vmem:[#allocation8 + $0x1b8] sm:$0xff]  ;;  %188 = vmatpush.msra.mxu2 %v847_v14  ;;  %v867_v21 = vld [vmem:[#allocation8 + $0x1a0] sm:$0xff]  ;;  %v871_v22 = vld [vmem:[#allocation8 + $0xa8] sm:$0xff] }
  0x15   :  { %168 = vmatpush.msra.mxu1 %v843_v13  ;;  %208 = vmatpush.msra.mxu3 %v849_v15  ;;  %v873_v23 = vld [vmem:[#allocation8 + $0x1a8] sm:$0xff]  ;;  %v877_v24 = vld [vmem:[#allocation8 + $0x90] sm:$0xff]  ;;  %v883_v26 = vld [vmem:[#allocation8 + $0x98] sm:$0xff] }
  0x16   :  { %149 = vmatpush.msra.mxu0 %v853_v16  ;;  %189 = vmatpush.msra.mxu2 %v859_v18  ;;  %v879_v25 = vld [vmem:[#allocation8 + $0x190] sm:$0xff]  ;;  %v885_v27 = vld [vmem:[#allocation8 + $0x198] sm:$0xff]  ;;  %v889_v28 = vld [vmem:[#allocation8 + $0x80] sm:$0xff] }
  0x17   :  { %169 = vmatpush.msra.mxu1 %v855_v17  ;;  %209 = vmatpush.msra.mxu3 %v861_v19  ;;  %v891_v29 = vld [vmem:[#allocation8 + $0x180] sm:$0xff]  ;;  %v895_v30 = vld [vmem:[#allocation8 + $0x88] sm:$0xff]  ;;  %v901_v32 = vld [vmem:[#allocation8 + $0x70] sm:$0xff] }
  0x18   :  { %150 = vmatpush.msra.mxu0 %v865_v20  ;;  %190 = vmatpush.msra.mxu2 %v871_v22  ;;  %v897_v31 = vld [vmem:[#allocation8 + $0x188] sm:$0xff]  ;;  %v903_v33 = vld [vmem:[#allocation8 + $0x170] sm:$0xff]  ;;  %v907_v34 = vld [vmem:[#allocation8 + $0x78] sm:$0xff] }
  0x19   :  { %170 = vmatpush.msra.mxu1 %v867_v21  ;;  %210 = vmatpush.msra.mxu3 %v873_v23  ;;  %v909_v35 = vld [vmem:[#allocation8 + $0x178] sm:$0xff]  ;;  %v913_v36 = vld [vmem:[#allocation8 + $0x60] sm:$0xff]  ;;  %v919_v38 = vld [vmem:[#allocation8 + $0x68] sm:$0xff] }
  0x1a   :  { %151 = vmatpush.msra.mxu0 %v877_v24  ;;  %191 = vmatpush.msra.mxu2 %v883_v26  ;;  %v915_v37 = vld [vmem:[#allocation8 + $0x160] sm:$0xff]  ;;  %v921_v39 = vld [vmem:[#allocation8 + $0x168] sm:$0xff]  ;;  %v925_v40 = vld [vmem:[#allocation8 + $0x50] sm:$0xff] }
  0x1b   :  { %171 = vmatpush.msra.mxu1 %v879_v25  ;;  %211 = vmatpush.msra.mxu3 %v885_v27  ;;  %v927_v41 = vld [vmem:[#allocation8 + $0x150] sm:$0xff]  ;;  %v931_v42 = vld [vmem:[#allocation8 + $0x58] sm:$0xff]  ;;  %v937_v44 = vld [vmem:[#allocation8 + $0x40] sm:$0xff] }
  0x1c   :  { %152 = vmatpush.msra.mxu0 %v889_v28  ;;  %192 = vmatpush.msra.mxu2 %v895_v30  ;;  %v933_v43 = vld [vmem:[#allocation8 + $0x158] sm:$0xff]  ;;  %1339 = vst [vmem:[#allocation16_spill] sm:$0xff] %v937_v44  ;;  %v939_v45 = vld [vmem:[#allocation8 + $0x140] sm:$0xff]  ;;  %v943_v46 = vld [vmem:[#allocation8 + $0x48] sm:$0xff] }
  0x1d   :  { %172 = vmatpush.msra.mxu1 %v891_v29  ;;  %212 = vmatpush.msra.mxu3 %v897_v31  ;;  %1338 = vst [vmem:[#allocation15_spill] sm:$0xff] %v933_v43  ;;  %v945_v47 = vld [vmem:[#allocation8 + $0x148] sm:$0xff]  ;;  %v73_v48 = vld [vmem:[#allocation3] sm:$0xf]  ;;  %v949_v49 = vld [vmem:[#allocation8 + $0x30] sm:$0xff] }
  0x1e   :  { %153 = vmatpush.msra.mxu0 %v901_v32  ;;  %193 = vmatpush.msra.mxu2 %v907_v34  ;;  %1340 = vst [vmem:[#allocation17_spill] sm:$0xff] %v945_v47  ;;  %v951_v50 = vld [vmem:[#allocation8 + $0x130] sm:$0xff]  ;;  %v955_v51 = vld [vmem:[#allocation8 + $0x38] sm:$0xff]  ;;  %v961_v53 = vld [vmem:[#allocation8 + $0x20] sm:$0xff] }
  0x1f   :  { %173 = vmatpush.msra.mxu1 %v903_v33  ;;  %213 = vmatpush.msra.mxu3 %v909_v35  ;;  %1341 = vst [vmem:[#allocation18_spill] sm:$0xff] %v951_v50  ;;  %v957_v52 = vld [vmem:[#allocation8 + $0x138] sm:$0xff]  ;;  %v963_v54 = vld [vmem:[#allocation8 + $0x120] sm:$0xff]  ;;  %v969_v56 = vld [vmem:[#allocation8 + $0x28] sm:$0xff] }
  0x20   :  { %154 = vmatpush.msra.mxu0 %v913_v36  ;;  %194 = vmatpush.msra.mxu2 %v919_v38  ;;  %140 = vst [vmem:[#allocation1] ss:$4 sm:$0xff] %v73_v48  ;;  %v965_v55 = vld [vmem:[#allocation6] sm:$0xf]  ;;  %v971_v57 = vld [vmem:[#allocation8 + $0x128] sm:$0xff]  ;;  %v978_v59 = vld [vmem:[#allocation8 + $0x10] sm:$0xff] }
  0x21   :  { %174 = vmatpush.msra.mxu1 %v915_v37  ;;  %214 = vmatpush.msra.mxu3 %v921_v39  ;;  %1342 = vst [vmem:[#allocation19_spill] sm:$0xff] %v955_v51  ;;  %v974_v58 = vmul.f32 %v965_v55, %v73_v48  ;;  %v980_v60 = vld [vmem:[#allocation8 + $0x110] sm:$0xff]  ;;  %v984_v61 = vld [vmem:[#allocation8 + $0x18] sm:$0xff]  ;;  %v988_v63 = vld [vmem:[#allocation8] sm:$0xff] }
  0x22   :  { %155 = vmatpush.msra.mxu0 %v925_v40  ;;  %195 = vmatpush.msra.mxu2 %v931_v42  ;;  %1343 = vst [vmem:[#allocation20_spill] sm:$0xff] %v957_v52  ;;  %v986_v62 = vld [vmem:[#allocation8 + $0x118] sm:$0xff] }
  0x23   :  { %175 = vmatpush.msra.mxu1 %v927_v41  ;;  %215 = vmatpush.msra.mxu3 %v933_v43  ;;  %1344 = vst [vmem:[#allocation21_spill] sm:$0xff] %v961_v53 }
  0x24   :  { %156 = vmatpush.msra.mxu0 %v937_v44  ;;  %196 = vmatpush.msra.mxu2 %v943_v46  ;;  %1345 = vst [vmem:[#allocation22_spill] sm:$0xff] %v963_v54 }
  0x25   :  { %176 = vmatpush.msra.mxu1 %v939_v45  ;;  %216 = vmatpush.msra.mxu3 %v945_v47  ;;  %1346 = vst [vmem:[#allocation23_spill] sm:$0xff] %v965_v55 }
  0x26   :  { %157 = vmatpush.msra.mxu0 %v949_v49  ;;  %1347 = vst [vmem:[#allocation24_spill] sm:$0xff] %v974_v58  ;;  %197 = vmatpush.msra.mxu2 %v955_v51  ;;  %v992_v58 = vld [vmem:[#allocation8 + $0x100] sm:$0xff]  ;;  %v996_v51 = vld [vmem:[#allocation8 + $0x108] sm:$0xff] }
  0x27   :  { %177 = vmatpush.msra.mxu1 %v951_v50  ;;  %217 = vmatpush.msra.mxu3 %v957_v52  ;;  %1348 = vst [vmem:[#allocation25_spill] sm:$0xff] %v980_v60  ;;  %v994_v52 = vld [vmem:[#allocation8 + $0x8] sm:$0xff] }
  0x28   :  { %158 = vmatpush.msra.mxu0 %v961_v53  ;;  %1349 = vst [vmem:[#allocation26_spill] sm:$0xff] %v984_v61  ;;  %198 = vmatpush.msra.mxu2 %v969_v56  ;;  %v1002_v53 = vld.sshfl [vmem:[#allocation1 + $0x8] sm:$0xff pattern:$0x73625140] }
  0x29   :  { %178 = vmatpush.msra.mxu1 %v963_v54  ;;  %1350 = vst [vmem:[#allocation27_spill] sm:$0xff] %v986_v62  ;;  %218 = vmatpush.msra.mxu3 %v971_v57  ;;  %v1000_v54 = vld.sshfl [vmem:[#allocation1] sm:$0xff pattern:$0x73625140] }
  0x2a   :  { %1351 = vst [vmem:[#allocation28_spill] sm:$0xff] %v988_v63  ;;  %159 = vmatpush.msra.mxu0 %v978_v59  ;;  %199 = vmatpush.msra.mxu2 %v984_v61 }
  0x2b   :  { %1352 = vst [vmem:[#allocation29_spill] sm:$0xff] %v992_v58  ;;  %179 = vmatpush.msra.mxu1 %v980_v60  ;;  %219 = vmatpush.msra.mxu3 %v986_v62 }
  0x2c   :  { %226 = vst [vmem:[#allocation1] ss:$4 sm:$0xff] %v965_v55  ;;  %160 = vmatpush.msra.mxu0 %v988_v63  ;;  %200 = vmatpush.msra.mxu2 %v994_v52  ;;  %v311_v55 = vmul.f32 %v73_v48, %v73_v48  ;;  %v1353_v48 = vld [vmem:[#allocation19_spill] sm:$0xff] }
  0x2d   :  { %180 = vmatpush.msra.mxu1 %v992_v58  ;;  %220 = vmatpush.msra.mxu3 %v996_v51 }
  0x2e   :  { %231 = vmatpush.msrb.mxu0 %v809_v0  ;;  %271 = vmatpush.msrb.mxu2 %v813_v2 }
  0x2f   :  { %251 = vmatpush.msrb.mxu1 %v811_v1  ;;  %291 = vmatpush.msrb.mxu3 %v817_v3 }
  0x30   :  { %232 = vmatpush.msrb.mxu0 %v819_v4  ;;  %272 = vmatpush.msrb.mxu2 %v825_v6 }
  0x31   :  { %252 = vmatpush.msrb.mxu1 %v821_v5  ;;  %292 = vmatpush.msrb.mxu3 %v827_v7 }
  0x32   :  { %233 = vmatpush.msrb.mxu0 %v829_v8  ;;  %273 = vmatpush.msrb.mxu2 %v835_v10 }
  0x33   :  { %253 = vmatpush.msrb.mxu1 %v833_v9  ;;  %v1021_v0 = vld.sshfl [vmem:[#allocation1] sm:$0xff pattern:$0x73625140]  ;;  %v1023_v1 = vld.sshfl [vmem:[#allocation1 + $0x8] sm:$0xff pattern:$0x73625140]  ;;  %293 = vmatpush.msrb.mxu3 %v837_v11 }
  0x34   :  { %313 = vst [vmem:[#allocation1] ss:$4 sm:$0xff] %v311_v55  ;;  %234 = vmatpush.msrb.mxu0 %v841_v12  ;;  %274 = vmatpush.msrb.mxu2 %v847_v14  ;;  %v1354_v55 = vld [vmem:[#allocation20_spill] sm:$0xff] }
  0x35   :  { %254 = vmatpush.msrb.mxu1 %v843_v13  ;;  %294 = vmatpush.msrb.mxu3 %v849_v15 }
  0x36   :  { %235 = vmatpush.msrb.mxu0 %v853_v16  ;;  %275 = vmatpush.msrb.mxu2 %v859_v18 }
  0x37   :  { %255 = vmatpush.msrb.mxu1 %v855_v17  ;;  %295 = vmatpush.msrb.mxu3 %v861_v19 }
  0x38   :  { %236 = vmatpush.msrb.mxu0 %v865_v20  ;;  %276 = vmatpush.msrb.mxu2 %v871_v22 }
  0x39   :  { %256 = vmatpush.msrb.mxu1 %v867_v21  ;;  %296 = vmatpush.msrb.mxu3 %v873_v23 }
  0x3a   :  { %237 = vmatpush.msrb.mxu0 %v877_v24  ;;  %277 = vmatpush.msrb.mxu2 %v883_v26 }
  0x3b   :  { %257 = vmatpush.msrb.mxu1 %v879_v25  ;;  %297 = vmatpush.msrb.mxu3 %v885_v27 }
  0x3c   :  { %238 = vmatpush.msrb.mxu0 %v889_v28  ;;  %278 = vmatpush.msrb.mxu2 %v895_v30 }
  0x3d   :  { %258 = vmatpush.msrb.mxu1 %v891_v29  ;;  %298 = vmatpush.msrb.mxu3 %v897_v31 }
  0x3e   :  { %239 = vmatpush.msrb.mxu0 %v901_v32  ;;  %279 = vmatpush.msrb.mxu2 %v907_v34 }
  0x3f   :  { %259 = vmatpush.msrb.mxu1 %v903_v33  ;;  %299 = vmatpush.msrb.mxu3 %v909_v35 }
  0x40   :  { %240 = vmatpush.msrb.mxu0 %v913_v36  ;;  %280 = vmatpush.msrb.mxu2 %v919_v38 }
  0x41   :  { %260 = vmatpush.msrb.mxu1 %v915_v37  ;;  %300 = vmatpush.msrb.mxu3 %v921_v39 }
  0x42   :  { %241 = vmatpush.msrb.mxu0 %v925_v40  ;;  %281 = vmatpush.msrb.mxu2 %v931_v42 }
  0x43   :  { %261 = vmatpush.msrb.mxu1 %v927_v41  ;;  %301 = vmatpush.msrb.mxu3 %v933_v43  ;;  %v1355_v43 = vld [vmem:[#allocation21_spill] sm:$0xff] }
  0x44   :  { %242 = vmatpush.msrb.mxu0 %v937_v44  ;;  %282 = vmatpush.msrb.mxu2 %v943_v46  ;;  %v1356_v44 = vld [vmem:[#allocation22_spill] sm:$0xff] }
  0x45   :  { %262 = vmatpush.msrb.mxu1 %v939_v45  ;;  %302 = vmatpush.msrb.mxu3 %v945_v47 }
  0x46   :  { %201 = vmatmul.f32.vlgmr.msra.gmra.mxu2 %v1000_v54  ;;  %221 = vmatmul.f32.vlgmr.msra.gmra.mxu3 %v1002_v53 }
  0x47   :  { %243 = vmatpush.msrb.mxu0 %v949_v49  ;;  %263 = vmatpush.msrb.mxu1 %v951_v50 }
  0x48   :  { %283 = vmatpush.msrb.mxu2 %v1353_v48  ;;  %303 = vmatpush.msrb.mxu3 %v1354_v55  ;;  %v1357_v55 = vld [vmem:[#allocation23_spill] sm:$0xff] }
  0x49   :  { %244 = vmatpush.msrb.mxu0 %v1355_v43  ;;  %264 = vmatpush.msrb.mxu1 %v1356_v44  ;;  %v398_v43 = vmul.f32 %v1357_v55, %v1357_v55  ;;  %v1365_v55 = vld [vmem:[#allocation27_spill] sm:$0xff] }
  0x4a   :  { %284 = vmatpush.msrb.mxu2 %v969_v56  ;;  %304 = vmatpush.msrb.mxu3 %v971_v57 }
  0x4b   :  { %245 = vmatpush.msrb.mxu0 %v978_v59  ;;  %265 = vmatpush.msrb.mxu1 %v980_v60 }
  0x4c   :  { %285 = vmatpush.msrb.mxu2 %v984_v61  ;;  %305 = vmatpush.msrb.mxu3 %v986_v62  ;;  %v1358_v62 = vld [vmem:[#allocation13_spill] sm:$0xff]  ;;  %v1091_v61 = vld.sshfl [vmem:[#allocation1 + $0x8] sm:$0xff pattern:$0x73625140] }
  0x4d   :  { %246 = vmatpush.msrb.mxu0 %v988_v63  ;;  %266 = vmatpush.msrb.mxu1 %v992_v58  ;;  %v1359_v63 = vld [vmem:[#allocation14_spill] sm:$0xff] }
  0x4e   :  { %286 = vmatpush.msrb.mxu2 %v994_v52  ;;  %306 = vmatpush.msrb.mxu3 %v996_v51  ;;  %v1089_v58 = vld.sshfl [vmem:[#allocation1] sm:$0xff pattern:$0x73625140] }
  0x4f   :  { %161 = vmatmul.f32.vlgmr.msra.gmra.mxu0 %v1000_v54  ;;  %181 = vmatmul.f32.vlgmr.msra.gmra.mxu1 %v1002_v53  ;;  %400 = vst [vmem:[#allocation1] ss:$4 sm:$0xff] %v398_v43  ;;  %v1362_v43 = vld [vmem:[#allocation20_spill] sm:$0xff]  ;;  %v1363_v53 = vld [vmem:[#allocation21_spill] sm:$0xff]  ;;  %v1364_v54 = vld [vmem:[#allocation26_spill] sm:$0xff] }
  0x50   :  { %287 = vmatmul.f32.vlgmr.msrb.gmra.mxu2 %v1021_v0  ;;  %307 = vmatmul.f32.vlgmr.msrb.gmra.mxu3 %v1023_v1 }
  0x51   :  { %318 = vmatpush.msra.mxu0 %v1358_v62  ;;  %338 = vmatpush.msra.mxu1 %v1359_v63 }
  0x52   :  { %358 = vmatpush.msra.mxu2 %v813_v2  ;;  %378 = vmatpush.msra.mxu3 %v817_v3 }
  0x53   :  { %319 = vmatpush.msra.mxu0 %v819_v4  ;;  %339 = vmatpush.msra.mxu1 %v821_v5 }
  0x54   :  { %359 = vmatpush.msra.mxu2 %v825_v6  ;;  %379 = vmatpush.msra.mxu3 %v827_v7 }
  0x55   :  { %320 = vmatpush.msra.mxu0 %v829_v8  ;;  %340 = vmatpush.msra.mxu1 %v833_v9 }
  0x56   :  { %360 = vmatpush.msra.mxu2 %v835_v10  ;;  %380 = vmatpush.msra.mxu3 %v837_v11 }
  0x57   :  { %321 = vmatpush.msra.mxu0 %v841_v12  ;;  %341 = vmatpush.msra.mxu1 %v843_v13 }
  0x58   :  { %361 = vmatpush.msra.mxu2 %v847_v14  ;;  %381 = vmatpush.msra.mxu3 %v849_v15 }
  0x59   :  { %247 = vmatmul.f32.vlgmr.msrb.gmra.mxu0 %v1021_v0  ;;  %267 = vmatmul.f32.vlgmr.msrb.gmra.mxu1 %v1023_v1  ;;  %v1360_v0 = vld [vmem:[#allocation15_spill] sm:$0xff]  ;;  %v1361_v1 = vld [vmem:[#allocation16_spill] sm:$0xff] }
  0x5a   :  { %322 = vmatpush.msra.mxu0 %v853_v16  ;;  %342 = vmatpush.msra.mxu1 %v855_v17 }
  0x5b   :  { %362 = vmatpush.msra.mxu2 %v859_v18  ;;  %382 = vmatpush.msra.mxu3 %v861_v19 }
  0x5c   :  { %323 = vmatpush.msra.mxu0 %v865_v20  ;;  %343 = vmatpush.msra.mxu1 %v867_v21 }
  0x5d   :  { %363 = vmatpush.msra.mxu2 %v871_v22  ;;  %383 = vmatpush.msra.mxu3 %v873_v23 }
  0x5e   :  { %324 = vmatpush.msra.mxu0 %v877_v24  ;;  %344 = vmatpush.msra.mxu1 %v879_v25 }
  0x5f   :  { %364 = vmatpush.msra.mxu2 %v883_v26  ;;  %384 = vmatpush.msra.mxu3 %v885_v27 }
  0x60   :  { %325 = vmatpush.msra.mxu0 %v889_v28  ;;  %345 = vmatpush.msra.mxu1 %v891_v29 }
  0x61   :  { %365 = vmatpush.msra.mxu2 %v895_v30  ;;  %385 = vmatpush.msra.mxu3 %v897_v31 }
  0x62   :  { %326 = vmatpush.msra.mxu0 %v901_v32  ;;  %346 = vmatpush.msra.mxu1 %v903_v33 }
  0x63   :  { %366 = vmatpush.msra.mxu2 %v907_v34  ;;  %386 = vmatpush.msra.mxu3 %v909_v35 }
  0x64   :  { %327 = vmatpush.msra.mxu0 %v913_v36  ;;  %347 = vmatpush.msra.mxu1 %v915_v37 }
  0x65   :  { %367 = vmatpush.msra.mxu2 %v919_v38  ;;  %387 = vmatpush.msra.mxu3 %v921_v39 }
  0x66   :  { %328 = vmatpush.msra.mxu0 %v925_v40  ;;  %348 = vmatpush.msra.mxu1 %v927_v41 }
  0x67   :  { %368 = vmatpush.msra.mxu2 %v931_v42  ;;  %388 = vmatpush.msra.mxu3 %v1360_v0 }
  0x68   :  { %329 = vmatpush.msra.mxu0 %v1361_v1  ;;  %349 = vmatpush.msra.mxu1 %v939_v45 }
  0x69   :  { %369 = vmatpush.msra.mxu2 %v943_v46  ;;  %389 = vmatpush.msra.mxu3 %v945_v47 }
  0x6a   :  { %330 = vmatpush.msra.mxu0 %v949_v49  ;;  %350 = vmatpush.msra.mxu1 %v951_v50  ;;  %v1366_v50 = vld [vmem:[#allocation28_spill] sm:$0xff] }
  0x6b   :  { %370 = vmatpush.msra.mxu2 %v1353_v48  ;;  %390 = vmatpush.msra.mxu3 %v1362_v43  ;;  %v1367_v48 = vld [vmem:[#allocation29_spill] sm:$0xff] }
  0x6c   :  { %331 = vmatpush.msra.mxu0 %v1363_v53  ;;  %351 = vmatpush.msra.mxu1 %v1356_v44 }
  0x6d   :  { %371 = vmatpush.msra.mxu2 %v969_v56  ;;  %391 = vmatpush.msra.mxu3 %v971_v57 }
  0x6e   :  { %332 = vmatpush.msra.mxu0 %v978_v59  ;;  %352 = vmatpush.msra.mxu1 %v980_v60  ;;  %v1161_v60 = vld.sshfl [vmem:[#allocation1] sm:$0xff pattern:$0x73625140] }
  0x6f   :  { %372 = vmatpush.msra.mxu2 %v1364_v54  ;;  %392 = vmatpush.msra.mxu3 %v1365_v55  ;;  %v1163_v54 = vld.sshfl [vmem:[#allocation1 + $0x8] sm:$0xff pattern:$0x73625140] }
  0x70   :  { %333 = vmatpush.msra.mxu0 %v1366_v50  ;;  %353 = vmatpush.msra.mxu1 %v1367_v48  ;;  %v1368_v48 = vld [vmem:[#allocation24_spill] sm:$0xff] }
  0x71   :  { %373 = vmatpush.msra.mxu2 %v994_v52  ;;  %393 = vmatpush.msra.mxu3 %v996_v51  ;;  %487 = vst [vmem:[#allocation1] ss:$4 sm:$0xff] %v1368_v48  ;;  %v1371_v48 = vld [vmem:[#allocation25_spill] sm:$0xff] }
  0x72   :  { %334 = vmatmul.f32.vlgmr.msra.gmra.mxu0 %v1089_v58  ;;  %354 = vmatmul.f32.vlgmr.msra.gmra.mxu1 %v1091_v61 }
  0x73   :  { %374 = vmatmul.f32.vlgmr.msra.gmra.mxu2 %v1089_v58  ;;  %394 = vmatmul.f32.vlgmr.msra.gmra.mxu3 %v1091_v61  ;;  %v1369_v58 = vld [vmem:[#allocation18_spill] sm:$0xff]  ;;  %v1370_v61 = vld [vmem:[#allocation19_spill] sm:$0xff] }
  0x74   :  { %405 = vmatpush.msrb.mxu0 %v1358_v62  ;;  %425 = vmatpush.msrb.mxu1 %v1359_v63 }
  0x75   :  { %445 = vmatpush.msrb.mxu2 %v813_v2  ;;  %465 = vmatpush.msrb.mxu3 %v817_v3 }
  0x76   :  { %406 = vmatpush.msrb.mxu0 %v819_v4  ;;  %426 = vmatpush.msrb.mxu1 %v821_v5 }
  0x77   :  { %446 = vmatpush.msrb.mxu2 %v825_v6  ;;  %466 = vmatpush.msrb.mxu3 %v827_v7 }
  0x78   :  { %407 = vmatpush.msrb.mxu0 %v829_v8  ;;  %427 = vmatpush.msrb.mxu1 %v833_v9 }
  0x79   :  { %447 = vmatpush.msrb.mxu2 %v835_v10  ;;  %467 = vmatpush.msrb.mxu3 %v837_v11 }
  0x7a   :  { %408 = vmatpush.msrb.mxu0 %v841_v12  ;;  %428 = vmatpush.msrb.mxu1 %v843_v13 }
  0x7b   :  { %448 = vmatpush.msrb.mxu2 %v847_v14  ;;  %468 = vmatpush.msrb.mxu3 %v849_v15 }
  0x7c   :  { %409 = vmatpush.msrb.mxu0 %v853_v16  ;;  %429 = vmatpush.msrb.mxu1 %v855_v17 }
  0x7d   :  { %449 = vmatpush.msrb.mxu2 %v859_v18  ;;  %469 = vmatpush.msrb.mxu3 %v861_v19 }
  0x7e   :  { %410 = vmatpush.msrb.mxu0 %v865_v20  ;;  %430 = vmatpush.msrb.mxu1 %v867_v21 }
  0x7f   :  { %450 = vmatpush.msrb.mxu2 %v871_v22  ;;  %470 = vmatpush.msrb.mxu3 %v873_v23 }
  0x80   :  { %411 = vmatpush.msrb.mxu0 %v877_v24  ;;  %431 = vmatpush.msrb.mxu1 %v879_v25 }
  0x81   :  { %451 = vmatpush.msrb.mxu2 %v883_v26  ;;  %471 = vmatpush.msrb.mxu3 %v885_v27 }
  0x82   :  { %412 = vmatpush.msrb.mxu0 %v889_v28  ;;  %432 = vmatpush.msrb.mxu1 %v891_v29 }
  0x83   :  { %452 = vmatpush.msrb.mxu2 %v895_v30  ;;  %472 = vmatpush.msrb.mxu3 %v897_v31 }
  0x84   :  { %413 = vmatpush.msrb.mxu0 %v901_v32  ;;  %433 = vmatpush.msrb.mxu1 %v903_v33 }
  0x85   :  { %453 = vmatpush.msrb.mxu2 %v907_v34  ;;  %473 = vmatpush.msrb.mxu3 %v909_v35 }
  0x86   :  { %414 = vmatpush.msrb.mxu0 %v913_v36  ;;  %434 = vmatpush.msrb.mxu1 %v915_v37 }
  0x87   :  { %454 = vmatpush.msrb.mxu2 %v919_v38  ;;  %474 = vmatpush.msrb.mxu3 %v921_v39 }
  0x88   :  { %415 = vmatpush.msrb.mxu0 %v925_v40  ;;  %435 = vmatpush.msrb.mxu1 %v927_v41 }
  0x89   :  { %455 = vmatpush.msrb.mxu2 %v931_v42  ;;  %475 = vmatpush.msrb.mxu3 %v1360_v0 }
  0x8a   :  { %416 = vmatpush.msrb.mxu0 %v1361_v1  ;;  %436 = vmatpush.msrb.mxu1 %v939_v45 }
  0x8b   :  { %456 = vmatpush.msrb.mxu2 %v943_v46  ;;  %476 = vmatpush.msrb.mxu3 %v945_v47  ;;  %v1372_v47 = vld [vmem:[#allocation26_spill] sm:$0xff] }
  0x8c   :  { %417 = vmatpush.msrb.mxu0 %v949_v49  ;;  %437 = vmatpush.msrb.mxu1 %v1369_v58 }
  0x8d   :  { %457 = vmatpush.msrb.mxu2 %v1370_v61  ;;  %477 = vmatpush.msrb.mxu3 %v1362_v43  ;;  %v1373_v61 = vld [vmem:[#allocation29_spill] sm:$0xff] }
  0x8e   :  { %418 = vmatpush.msrb.mxu0 %v1363_v53  ;;  %438 = vmatpush.msrb.mxu1 %v1356_v44 }
  0x8f   :  { %458 = vmatpush.msrb.mxu2 %v969_v56  ;;  %478 = vmatpush.msrb.mxu3 %v971_v57 }
  0x90   :  { %419 = vmatpush.msrb.mxu0 %v978_v59  ;;  %439 = vmatpush.msrb.mxu1 %v1371_v48 }
  0x91   :  { %459 = vmatpush.msrb.mxu2 %v1372_v47  ;;  %479 = vmatpush.msrb.mxu3 %v1365_v55 }
  0x92   :  { %420 = vmatpush.msrb.mxu0 %v1366_v50  ;;  %440 = vmatpush.msrb.mxu1 %v1373_v61 }
  0x93   :  { %460 = vmatpush.msrb.mxu2 %v994_v52  ;;  %480 = vmatpush.msrb.mxu3 %v996_v51 }
  0x94   :  { %421 = vmatmul.f32.vlgmr.msrb.gmra.mxu0 %v1161_v60  ;;  %441 = vmatmul.f32.vlgmr.msrb.gmra.mxu1 %v1163_v54 }
  0x95   :  { %461 = vmatmul.f32.vlgmr.msrb.gmra.mxu2 %v1161_v60  ;;  %481 = vmatmul.f32.vlgmr.msrb.gmra.mxu3 %v1163_v54 }
  0x96   :  { %492 = vmatpush.msra.mxu0 %v1358_v62  ;;  %512 = vmatpush.msra.mxu1 %v1359_v63 }
  0x97   :  { %532 = vmatpush.msra.mxu2 %v813_v2  ;;  %552 = vmatpush.msra.mxu3 %v817_v3  ;;  %v1374_v2 = vld [vmem:[#allocation17_spill] sm:$0xff]  ;;  %v1375_v3 = vld [vmem:[#allocation19_spill] sm:$0xff] }
  0x98   :  { %493 = vmatpush.msra.mxu0 %v819_v4  ;;  %513 = vmatpush.msra.mxu1 %v821_v5  ;;  %v488_v4 = vld.sshfl [vmem:[#allocation1] sm:$0xff pattern:$0x73625140]  ;;  %v489_v5 = vld.sshfl [vmem:[#allocation1 + $0x8] sm:$0xff pattern:$0x73625140] }
  0x99   :  { %533 = vmatpush.msra.mxu2 %v825_v6  ;;  %553 = vmatpush.msra.mxu3 %v827_v7 }
  0x9a   :  { %494 = vmatpush.msra.mxu0 %v829_v8  ;;  %514 = vmatpush.msra.mxu1 %v833_v9 }
  0x9b   :  { %534 = vmatpush.msra.mxu2 %v835_v10  ;;  %554 = vmatpush.msra.mxu3 %v837_v11 }
  0x9c   :  { %495 = vmatpush.msra.mxu0 %v841_v12  ;;  %515 = vmatpush.msra.mxu1 %v843_v13 }
  0x9d   :  { %535 = vmatpush.msra.mxu2 %v847_v14  ;;  %555 = vmatpush.msra.mxu3 %v849_v15 }
  0x9e   :  { %496 = vmatpush.msra.mxu0 %v853_v16  ;;  %516 = vmatpush.msra.mxu1 %v855_v17 }
  0x9f   :  { %536 = vmatpush.msra.mxu2 %v859_v18  ;;  %556 = vmatpush.msra.mxu3 %v861_v19 }
  0xa0   :  { %497 = vmatpush.msra.mxu0 %v865_v20  ;;  %517 = vmatpush.msra.mxu1 %v867_v21 }
  0xa1   :  { %537 = vmatpush.msra.mxu2 %v871_v22  ;;  %557 = vmatpush.msra.mxu3 %v873_v23 }
  0xa2   :  { %498 = vmatpush.msra.mxu0 %v877_v24  ;;  %518 = vmatpush.msra.mxu1 %v879_v25 }
  0xa3   :  { %538 = vmatpush.msra.mxu2 %v883_v26  ;;  %558 = vmatpush.msra.mxu3 %v885_v27 }
  0xa4   :  { %499 = vmatpush.msra.mxu0 %v889_v28  ;;  %519 = vmatpush.msra.mxu1 %v891_v29 }
  0xa5   :  { %539 = vmatpush.msra.mxu2 %v895_v30  ;;  %559 = vmatpush.msra.mxu3 %v897_v31  ;;  %v778_v30 = vmov 0.0  }
  0xa6   :  { %500 = vmatpush.msra.mxu0 %v901_v32  ;;  %520 = vmatpush.msra.mxu1 %v903_v33  ;;  %72 = vst [vmem:[#allocation2] sm:$0xf] %v778_v30 }
  0xa7   :  { %540 = vmatpush.msra.mxu2 %v907_v34  ;;  %560 = vmatpush.msra.mxu3 %v909_v35 }
  0xa8   :  { %501 = vmatpush.msra.mxu0 %v913_v36  ;;  %521 = vmatpush.msra.mxu1 %v915_v37 }
  0xa9   :  { %541 = vmatpush.msra.mxu2 %v919_v38  ;;  %561 = vmatpush.msra.mxu3 %v921_v39 }
  0xaa   :  { %502 = vmatpush.msra.mxu0 %v925_v40  ;;  %522 = vmatpush.msra.mxu1 %v927_v41 }
  0xab   :  { %542 = vmatpush.msra.mxu2 %v931_v42  ;;  %562 = vmatpush.msra.mxu3 %v1360_v0 }
  0xac   :  { %503 = vmatpush.msra.mxu0 %v1361_v1  ;;  %523 = vmatpush.msra.mxu1 %v939_v45 }
  0xad   :  { %543 = vmatpush.msra.mxu2 %v943_v46  ;;  %563 = vmatpush.msra.mxu3 %v1374_v2 }
  0xae   :  { %504 = vmatpush.msra.mxu0 %v949_v49  ;;  %524 = vmatpush.msra.mxu1 %v1369_v58 }
  0xaf   :  { %544 = vmatpush.msra.mxu2 %v1375_v3  ;;  %564 = vmatpush.msra.mxu3 %v1362_v43 }
  0xb0   :  { %505 = vmatpush.msra.mxu0 %v1363_v53  ;;  %525 = vmatpush.msra.mxu1 %v1356_v44 }
  0xb1   :  { %545 = vmatpush.msra.mxu2 %v969_v56  ;;  %565 = vmatpush.msra.mxu3 %v971_v57 }
  0xb2   :  { %506 = vmatpush.msra.mxu0 %v978_v59  ;;  %526 = vmatpush.msra.mxu1 %v1371_v48 }
  0xb3   :  { %546 = vmatpush.msra.mxu2 %v1372_v47  ;;  %566 = vmatpush.msra.mxu3 %v1365_v55 }
  0xb4   :  { %507 = vmatpush.msra.mxu0 %v1366_v50  ;;  %527 = vmatpush.msra.mxu1 %v1373_v61 }
  0xb5   :  { %547 = vmatpush.msra.mxu2 %v994_v52  ;;  %567 = vmatpush.msra.mxu3 %v996_v51 }
  0xb6   :  { %508 = vmatmul.f32.vlgmr.msra.gmra.mxu0 %v488_v4  ;;  %528 = vmatmul.f32.vlgmr.msra.gmra.mxu1 %v489_v5 }
  0xb7   :  { %548 = vmatmul.f32.vlgmr.msra.gmra.mxu2 %v488_v4  ;;  %568 = vmatmul.f32.vlgmr.msra.gmra.mxu3 %v489_v5 }
  0xc9   :  { %v202_v6 = vpop.f32.mrf.mxu2  ;;  %v222_v7 = vpop.f32.mrf.mxu3 }
  0xca   :  { %v223_v18 = vadd.f32 %v222_v7, %v202_v6 }
  0xcc   :  { %v162_v8 = vpop.f32.mrf.mxu0  ;;  %v182_v9 = vpop.f32.mrf.mxu1  ;;  %v579_v27 = vmul.f32 %v223_v18, %v223_v18 }
  0xcd   :  { %v183_v22 = vadd.f32 %v182_v9, %v162_v8  ;;  %v606_v8 = vld [vmem:[#allocation2] sm:$0xf] }
  0xce   :  { %v581_v35 = vmul.f32 0.11111111, %v579_v27 }
  0xcf   :  { %v578_v31 = vmul.f32 %v183_v22, %v183_v22 }
  0xd1   :  { %v580_v39 = vmul.f32 0.11111111, %v578_v31 }
  0xd3   :  { %v288_v10 = vpop.f32.mrf.mxu2  ;;  %v308_v11 = vpop.f32.mrf.mxu3 }
  0xd4   :  { %v309_v19 = vadd.f32 %v308_v11, %v288_v10 }
  0xd6   :  { %v248_v12 = vpop.f32.mrf.mxu0  ;;  %v268_v13 = vpop.f32.mrf.mxu1  ;;  %v585_v23 = vmul.f32 %v309_v19, %v309_v19  ;;  %v573_v57 = vmul.f32 %v309_v19, %v223_v18 }
  0xd7   :  { %v269_v24 = vadd.f32 %v268_v13, %v248_v12 }
  0xd8   :  { %v587_v32 = vmul.f32 0.11111111, %v585_v23  ;;  %v575_v43 = vmul.f32 0.11111111, %v573_v57 }
  0xd9   :  { %v584_v28 = vmul.f32 %v269_v24, %v269_v24  ;;  %v572_v52 = vmul.f32 %v269_v24, %v183_v22 }
  0xdb   :  { %v586_v36 = vmul.f32 0.11111111, %v584_v28  ;;  %v574_v62 = vmul.f32 0.11111111, %v572_v52 }
  0xef   :  { %v335_v16 = vpop.f32.mrf.mxu0  ;;  %v355_v17 = vpop.f32.mrf.mxu1 }
  0xf0   :  { %v356_v37 = vadd.f32 %v355_v17, %v335_v16 }
  0xf2   :  { %v582_v42 = vsub.f32 %v356_v37, %v580_v39 }
  0xf6   :  { %v375_v14 = vpop.f32.mrf.mxu2  ;;  %v395_v15 = vpop.f32.mrf.mxu3 }
  0xf7   :  { %v396_v33 = vadd.f32 %v395_v15, %v375_v14 }
  0xf9   :  { %v583_v40 = vsub.f32 %v396_v33, %v581_v35 }
 0x111   :  { %v422_v25 = vpop.f32.mrf.mxu0  ;;  %v442_v26 = vpop.f32.mrf.mxu1 }
 0x112   :  { %v443_v34 = vadd.f32 %v442_v26, %v422_v25 }
 0x114   :  { %v588_v41 = vsub.f32 %v443_v34, %v586_v36 }
 0x116   :  { %v590_v45 = vmul.f32 %v588_v41, %v582_v42 }
 0x118   :  { %v462_v20 = vpop.f32.mrf.mxu2  ;;  %v482_v21 = vpop.f32.mrf.mxu3  ;;  %v592_v47 = vadd.f32 1e-05, %v590_v45 }
 0x119   :  { %v483_v29 = vadd.f32 %v482_v21, %v462_v20 }
 0x11b   :  { %v589_v38 = vsub.f32 %v483_v29, %v587_v32 }
 0x11d   :  { %v591_v44 = vmul.f32 %v589_v38, %v583_v40 }
 0x11f   :  { %v593_v46 = vadd.f32 1e-05, %v591_v44 }
 0x121   :  { %667 = vrcp.f32 %v593_v46 }
 0x122   :  { %669 = vrcp.f32 %v592_v47 }
 0x127   :  { %v668_v49 = vpop.eup %667 }
 0x128   :  { %v670_v56 = vpop.eup %669  ;;  %v597_v59 = vmul.f32 %v668_v49, %v593_v46 }
 0x129   :  { %v596_v63 = vmul.f32 %v670_v56, %v592_v47 }
 0x12a   :  { %v599_v53 = vsub.f32 2.0, %v597_v59 }
 0x12b   :  { %v598_v58 = vsub.f32 2.0, %v596_v63 }
 0x12c   :  { %v601_v2 = vmul.f32 %v668_v49, %v599_v53 }
 0x12d   :  { %v600_v4 = vmul.f32 %v670_v56, %v598_v58 }
 0x133   :  { %v509_v50 = vpop.f32.mrf.mxu0  ;;  %v529_v51 = vpop.f32.mrf.mxu1 }
 0x134   :  { %v530_v60 = vadd.f32 %v529_v51, %v509_v50 }
 0x136   :  { %v576_v54 = vsub.f32 %v530_v60, %v574_v62 }
 0x138   :  { %v602_v48 = vmul.f32 %v576_v54, %v576_v54 }
 0x13a   :  { %v549_v0 = vpop.f32.mrf.mxu2  ;;  %v569_v1 = vpop.f32.mrf.mxu3  ;;  %v604_v6 = vmul.f32 %v602_v48, %v600_v4 }
 0x13b   :  { %v570_v55 = vadd.f32 %v569_v1, %v549_v0 }
 0x13d   :  { %v577_v61 = vsub.f32 %v570_v55, %v575_v43 }
 0x13f   :  { %v603_v3 = vmul.f32 %v577_v61, %v577_v61 }
 0x141   :  { %v605_v5 = vmul.f32 %v603_v3, %v601_v2 }
 0x143   :  { %v609_v7 = vrot.slane %v605_v5, 6 }
 0x145   :  { %v611_v9 = vsel %vm610_vm0, %v604_v6, %v609_v7 }
 0x146   :  { %v613_v10 = vadd.f32 %v611_v9, %v606_v8 }
 0x148   :  { %614 = vst [vmem:[#allocation2] sm:$0xf] %v613_v10 }
 0x14f   :  { %v618_v11 = vld [vmem:[#allocation2] sm:$0xf] }
 0x150   :  { %620 = vst [vmem:[#allocation1] ss:$4 sm:$0xff] %v618_v11 }
 0x157   :  { %v621_v12 = vld.sshfl [vmem:[#allocation1] sm:$0xff pattern:$0x73625140]  ;;  %v622_v13 = vld.sshfl [vmem:[#allocation1 + $0x8] sm:$0xff pattern:$0x73625140] }
 0x158   :  { %v625_v14 = vsel %vm610_vm0, %v621_v12, 0.0  ;;  %v626_v15 = vsel %vm610_vm0, %v622_v13, 0.0 }
 0x159   :  { %v627_v16 = vadd.f32 %v626_v15, %v625_v14 }
 0x15b   :  { %628 = vadd.xlane.f32.xlu0 %v627_v16 }
 0x1ce   :  { %v629_v17 = vpop.xlane.xlu0 %628 }
 0x1cf   :  { %v630_v18 = vrot.slane %v629_v17, 4 }
 0x1d1   :  { %v631_v19 = vadd.f32 %v630_v18, %v629_v17 }
 0x1d3   :  { %v632_v20 = vrot.slane %v631_v19, 2 }
 0x1d5   :  { %v633_v21 = vadd.f32 %v632_v20, %v631_v19 }
 0x1d7   :  { %v634_v22 = vrot.slane %v633_v21, 1 }
 0x1d9   :  { %v635_v23 = vadd.f32 %v634_v22, %v633_v21 }
 0x1db   :  { %658 = vpush %v635_v23 }
 0x20c   :  { %s659_s4 = spop %658 }
 0x20d   :  { %v637_v24 = vstv %s659_s4 }
 0x20e   :  { %639 = vst [vmem:[#allocation9] sm:$0xff] %v637_v24 }
 0x20f   :  { %650 = dma.vmem_to_hbm [thread:$0]  %s646_s2, 128, %s648_s30, [#allocation5]  }
 0x210   :  { %771 = dma.done.wait [#allocation5], 128  }
 0x211   :  { %772 = vsyncadd [#allocation5], 4294967168 }
 0x212   :  { %655 = vsyncpa [#allocation4], 1 }
 0x213   :  { %656 = vsyncpa [#allocation7], 1 }
 0x214   :  { %657 = vsyncpa [#allocation5], 1 }

</bundles_post_ra>
